<compile_context>
chip_gen: v7x
topology: tpu7x:2x2x1
jax: 0.10.0
libtpu: 0.0.40
codegen_flags: <defaults>
</compile_context>

<pallas_src>
import jax
import jax.numpy as jnp
from jax.experimental import pallas as pl
from jax.experimental.pallas import tpu as pltpu

_SUBLANES = 8              # full (8, 128) f32 VMEM tile
_LANES = 128
_SLAB_ELEMS = _SUBLANES * _LANES
_SIZES = (72, 10, 3, 1)    # pose, beta, trans, scale element counts
_TOTAL = sum(_SIZES)       # 86


# ----------------------------------------------------------------------------
# Pallas kernel: single unmasked (8,128) vreg-tile load + store.  With
# input_output_aliases the output HBM buffer aliases the input slab, so the
# custom call is a pure pass-through with one DMA pair and no masked stores.
# ----------------------------------------------------------------------------
def _slab_copy_kernel(slab_ref, out_ref):
    out_ref[...] = slab_ref[...]


_slab_passthrough = pl.pallas_call(
    _slab_copy_kernel,
    out_shape=jax.ShapeDtypeStruct((_SUBLANES, _LANES), jnp.float32),
    in_specs=[pl.BlockSpec(memory_space=pltpu.MemorySpace.VMEM)],
    out_specs=pl.BlockSpec(memory_space=pltpu.MemorySpace.VMEM),
    # Output 0 aliases input 0 -> no separate output allocation for the copy.
    input_output_aliases={0: 0},
)


# ----------------------------------------------------------------------------
# Pack / unpack helpers.  Packing runs ONCE at construction / parameter
# update time (canonical storage), never per forward call.  Unpacking runs
# only at the final consumer.
# ----------------------------------------------------------------------------
def pack_params(pose, beta, trans, scale):
    flat = jnp.concatenate([
        jnp.asarray(pose, jnp.float32).reshape(-1),
        jnp.asarray(beta, jnp.float32).reshape(-1),
        jnp.asarray(trans, jnp.float32).reshape(-1),
        jnp.asarray(scale, jnp.float32).reshape(-1),
    ])
    slab = jnp.zeros((_SLAB_ELEMS,), jnp.float32).at[:flat.shape[0]].set(flat)
    return slab.reshape(_SUBLANES, _LANES)


def unpack_params(slab):
    flat = slab.reshape(-1)
    o1 = _SIZES[0]
    o2 = o1 + _SIZES[1]
    o3 = o2 + _SIZES[2]
    pose = flat[:o1].reshape(1, _SIZES[0])
    beta = flat[o1:o2].reshape(1, _SIZES[1])
    trans = flat[o2:o3].reshape(1, _SIZES[2])
    scale = flat[o3:o3 + 1]
    return pose, beta, trans, scale


# ----------------------------------------------------------------------------
# Module
# ----------------------------------------------------------------------------
class OptimizationSMPL:
    """JAX/Pallas port of the PyTorch OptimizationSMPL module."""

    def __init__(self, cfg: dict):
        pose = jnp.zeros((1, 72), dtype=jnp.float32)
        beta = jnp.zeros((1, 10), dtype=jnp.float32)
        trans = jnp.zeros((1, 3), dtype=jnp.float32)
        scale = jnp.ones((1,), dtype=jnp.float32)
        if 'init_params' in cfg:
            init_params = cfg['init_params']
            if 'pose' in init_params:
                pose = jnp.asarray(init_params['pose'], dtype=jnp.float32)
            if 'shape' in init_params:
                beta = jnp.asarray(init_params['shape'], dtype=jnp.float32)
            if 'trans' in init_params:
                trans = jnp.asarray(init_params['trans'], dtype=jnp.float32)
            if 'scale' in init_params:
                scale = jnp.asarray(init_params['scale'], dtype=jnp.float32)
                if scale.ndim == 0:            # Python scalar -> keep (1,) contract
                    scale = scale.reshape(1)
        # TODO(synk): refine_params only controls trainable-vs-frozen
        # (torch.nn.Parameter vs buffer); forward() semantics are identical,
        # so only the values are carried here.
        self.set_params(pose, beta, trans, scale)

    def set_params(self, pose, beta, trans, scale):
        """Update parameters; repacks the canonical slab ONCE here (not per call)."""
        self.pose = pose
        self.beta = beta
        self.trans = trans
        self.scale = scale
        self.packed = pack_params(pose, beta, trans, scale)

    # ---- hot path: no kernel, no DMA, no HLO ------------------------------
    def forward(self):
        return self.pose, self.beta, self.trans, self.scale

    # ---- optional kernel boundary ------------------------------------------
    def forward_packed_pallas(self):
        """Pass the canonical (8,128) slab through the Pallas kernel.

        Returns the slab itself; callers should keep working on the packed
        representation and only unpack at the final consumer.
        """
        return _slab_passthrough(self.packed)

    def forward_pallas(self):
        """Kernel boundary + unpack, matching forward()'s shapes/dtypes."""
        return unpack_params(self.forward_packed_pallas())

    __call__ = forward


if __name__ == "__main__":
    key = jax.random.PRNGKey(0)
    k_pose, k_beta, k_trans, k_scale = jax.random.split(key, 4)

    cfg = {
        'init_params': {
            'pose': jax.random.normal(k_pose, (1, 72), dtype=jnp.float32),
            'shape': jax.random.normal(k_beta, (1, 10), dtype=jnp.float32),
            'trans': jax.random.normal(k_trans, (1, 3), dtype=jnp.float32),
            'scale': jax.random.uniform(k_scale, (1,), dtype=jnp.float32) + 0.5,
        },
        'refine_params': ['pose', 'shape', 'trans', 'scale'],
    }

    model = OptimizationSMPL(cfg)

    # Hot path (no kernel): direct return.
    pose_d, beta_d, trans_d, scale_d = model()

    # Pallas kernel path: run once, block, verify exact pass-through.
    slab_out = model.forward_packed_pallas()
    jax.block_until_ready(slab_out)
    assert slab_out.shape == (_SUBLANES, _LANES) and slab_out.dtype == jnp.float32
    assert bool(jnp.all(slab_out == model.packed))

    pose_o, beta_o, trans_o, scale_o = model.forward_pallas()
    jax.block_until_ready((pose_o, beta_o, trans_o, scale_o))

    assert pose_o.shape == (1, 72) and pose_o.dtype == jnp.float32
    assert beta_o.shape == (1, 10) and beta_o.dtype == jnp.float32
    assert trans_o.shape == (1, 3) and trans_o.dtype == jnp.float32
    assert scale_o.shape == (1,) and scale_o.dtype == jnp.float32

    assert bool(jnp.all(pose_o == pose_d))
    assert bool(jnp.all(beta_o == beta_d))
    assert bool(jnp.all(trans_o == trans_d))
    assert bool(jnp.all(scale_o == scale_d))

    assert bool(jnp.all(pose_d == model.pose))
    assert bool(jnp.all(beta_d == model.beta))
    assert bool(jnp.all(trans_d == model.trans))
    assert bool(jnp.all(scale_d == model.scale))

    # Python-scalar scale promotion check (correctness concern from review).
    model2 = OptimizationSMPL({'init_params': {'scale': 2.0}})
    assert model2.scale.shape == (1,) and float(model2.scale[0]) == 2.0

    print("KERNEL_OK")
</pallas_src>

<mosaic_0001>
module attributes {stable_mosaic.version = 11 : i64} {
  func.func @_slab_copy_kernel(%arg0: memref<8x128xf32, #tpu.memory_space<vmem>>, %arg1: memref<8x128xf32, #tpu.memory_space<vmem>>) attributes {dimension_semantics = [], scalar_prefetch = 0 : i64, scratch_operands = 0 : i64, tpu.core_type = #tpu.core_type<tc>} {
    %c0 = arith.constant 0 : index
    %c0_0 = arith.constant 0 : index
    %0 = vector.load %arg0[%c0, %c0_0] : memref<8x128xf32, #tpu.memory_space<vmem>>, vector<8x128xf32>
    %c0_1 = arith.constant 0 : index
    %c0_2 = arith.constant 0 : index
    %1 = vector.load %arg1[%c0_1, %c0_2] : memref<8x128xf32, #tpu.memory_space<vmem>>, vector<8x128xf32>
    tpu.vector_store %arg1[%c0_1, %c0_2], %0 {strides = array<i32>} : memref<8x128xf32, #tpu.memory_space<vmem>>, vector<8x128xf32>,
    return
  }
}

</mosaic_0001>

<bundles_post_ra>
// kernel: tpu_custom_call.1
= control target key start
LH: loop header
LB: loop body
LE: loop exit
PB: predicated region body
PF: predicated region fallthrough
CT: control target
= control target key end

     0   :  { %6 = vsyncpa [#allocation3], 0  ;;  %s124_s0 = inlined_call_operand.hbm [shape: f32[8,128], index: 0, kind: input, shape index: {}, may-alias: {0,1}]   ;;  %s125_s1 = inlined_call_operand.hbm [shape: f32[8,128], index: 1, kind: output, shape index: {}, may-alias: {0,1}]  }
   0x1   :  { %7 = vsyncpa [#allocation4], 0  ;;  %s88_s6 = smov [#allocation2]   ;;  %s40_s10 = scalar_lea.hbm %s124_s0, 128 }
   0x2   :  { %s14_s7 = sshll.u32 %s88_s6, 4  ;;  %p41_p0 = scmp.ne.s32.totalorder %s124_s0, %s40_s10  ;;  %s15_s7 = int_to_ptr.vmem [resolvable:$true] %s14_s7 }
   0x3   :  { %p44_p1 = scmp.lt.u32.totalorder %s40_s10, %s124_s0 }
   0x5   :  { %p46_p2 = pnand %p44_p1, %p41_p0 }
   0x7   :  { %49 = shalt.err (!%p46_p2)
}
   0x8   :  { %s50_s15 = scalar_lea.vmem %s15_s7, 128  ;;  %p55_p4 = scmp.lt.s32.totalorder %s15_s7, %s15_s7 }
   0x9   :  { %p51_p3 = scmp.ne.s32.totalorder %s15_s7, %s50_s15  ;;  %p56_p5 = scmp.lt.s32.totalorder %s50_s15, %s50_s15 }
   0xb   :  { %p57_p6 = por %p56_p5, %p55_p4 }
   0xd   :  { %p58_p7 = pnand %p57_p6, %p51_p3 }
   0xf   :  { %61 = shalt.err (!%p58_p7)
}
  0x10   :  { %17 = dma.hbm_to_vmem [thread:$0]  %s124_s0, 128, %s15_s7, [#allocation3]  }
  0x11   :  { %84 = dma.done.wait [#allocation3], 128  }
  0x12   :  { %85 = vsyncadd [#allocation3], 4294967168  ;;  %s89_s18 = smov [#allocation5]   ;;  %v21_v0 = vld [vmem:[#allocation2] sm:$0xff] }
  0x13   :  { %s29_s19 = sshll.u32 %s89_s18, 4  ;;  %22 = vst [vmem:[#allocation5] sm:$0xff] %v21_v0  ;;  %s30_s19 = int_to_ptr.vmem [resolvable:$true] %s29_s19 }
  0x14   :  { %s62_s20 = scalar_lea.vmem %s30_s19, 128  ;;  %p67_p9 = scmp.lt.s32.totalorder %s30_s19, %s30_s19 }
  0x15   :  { %p63_p8 = scmp.ne.s32.totalorder %s30_s19, %s62_s20  ;;  %p68_p10 = scmp.lt.s32.totalorder %s62_s20, %s62_s20 }
  0x17   :  { %p69_p11 = por %p68_p10, %p67_p9 }
  0x19   :  { %p70_p12 = pnand %p69_p11, %p63_p8 }
  0x1b   :  { %73 = shalt.err (!%p70_p12)
}
  0x1c   :  { %s74_s23 = scalar_lea.hbm %s125_s1, 128 }
  0x1d   :  { %p75_p13 = scmp.ne.s32.totalorder %s125_s1, %s74_s23  ;;  %p78_p0 = scmp.lt.u32.totalorder %s74_s23, %s125_s1 }
  0x1f   :  { %p80_p1 = pnand %p78_p0, %p75_p13 }
  0x21   :  { %83 = shalt.err (!%p80_p1)
}
  0x22   :  { %32 = dma.vmem_to_hbm [thread:$0]  %s30_s19, 128, %s125_s1, [#allocation4]  }
  0x23   :  { %86 = dma.done.wait [#allocation4], 128  }
  0x24   :  { %87 = vsyncadd [#allocation4], 4294967168 }
  0x25   :  { %36 = vsyncpa [#allocation3], 1 }
  0x26   :  { %37 = vsyncpa [#allocation4], 1 }

</bundles_post_ra>
